<compile_context>
chip_gen: v6e
topology: v6e:2x2x1
jax: 0.10.0
libtpu: 0.0.40
codegen_flags: <defaults>
</compile_context>

<pallas_src>
import math

import jax
import jax.numpy as jnp
from jax.experimental import pallas as pl
from jax.experimental.pallas import tpu as pltpu


def _round_down(x, m):
    return max(m, (x // m) * m)


def semantic_attention_forward(z, params, *, tile_rows=2048, tile_nodes=512):
    """z: (N, M, D) float32 -> (N, D) float32."""
    N, M, D = z.shape
    w1 = params["w1"]          # (D, H)
    b1 = params["b1"]          # (H,)
    w2 = params["w2"]          # (H, 1)
    H = w1.shape[1]

    # ------------------------------------------------------------------
    # Pass 1: per-metapath sums of tanh(z @ W1 + b1), reduced over nodes.
    # ------------------------------------------------------------------
    total_rows = N * M
    z2 = z.reshape(total_rows, D)                 # free row-major reshape
    base = 8 * M                                  # multiple of 8 (sublanes) and of M
    tr = _round_down(min(tile_rows, total_rows), base)
    grid_a = pl.cdiv(total_rows, tr)

    w1_bf16 = w1.astype(jnp.bfloat16)
    b1_row = b1.reshape(1, H).astype(jnp.float32)
    # Selector: g[m, r] = 1 iff row r belongs to metapath m.  tr % M == 0, so the
    # row phase is identical in every tile (constant block, DMA'd once).
    g = (jnp.arange(tr)[None, :] % M == jnp.arange(8)[:, None]).astype(jnp.float32)

    def _hsum_kernel(z_ref, w1_ref, b1_ref, g_ref, out_ref):
        zt = z_ref[...].astype(jnp.bfloat16)                  # MXU-native input
        h = jnp.dot(zt, w1_ref[...], preferred_element_type=jnp.float32)
        h = jnp.tanh(h + b1_ref[...])                         # (tr, H) f32, EUP
        if total_rows % tr != 0:                              # mask tail rows only if needed
            row0 = pl.program_id(0) * tr
            rows = jax.lax.broadcasted_iota(jnp.int32, (tr, 1), 0) + row0
            h = jnp.where(rows < total_rows, h, 0.0)
        # (8, tr) @ (tr, H): per-metapath column sums, lane-dense (8, 128) output.
        out_ref[...] = jnp.dot(g_ref[...], h, preferred_element_type=jnp.float32)

    partial = pl.pallas_call(
        _hsum_kernel,
        out_shape=jax.ShapeDtypeStruct((grid_a, 8, H), jnp.float32),
        grid=(grid_a,),
        in_specs=[
            pl.BlockSpec((tr, D), lambda i: (i, 0)),
            pl.BlockSpec((D, H), lambda i: (0, 0)),
            pl.BlockSpec((1, H), lambda i: (0, 0)),
            pl.BlockSpec((8, tr), lambda i: (0, 0)),
        ],
        out_specs=pl.BlockSpec((None, 8, H), lambda i: (i, 0, 0)),
        compiler_params=pltpu.CompilerParams(
            dimension_semantics=("parallel",)),
    )(z2, w1_bf16, b1_row, g)

    # ------------------------------------------------------------------
    # Tiny epilogue (O(M*H)): mean over nodes, project H->1, softmax over M.
    # ------------------------------------------------------------------
    h_sum = jnp.sum(partial, axis=0)[:M]          # (M, H)
    w = (h_sum @ w2).reshape(M) / N               # == project(z).mean(0)
    beta = jax.nn.softmax(w, axis=0)              # (M,)

    # ------------------------------------------------------------------
    # Pass 2: out[n, :] = sum_m beta[m] * z[n, m, :]
    # ------------------------------------------------------------------
    z_r = z.reshape(N, M * D)                     # free row-major reshape
    tn = _round_down(min(tile_nodes, N), 8)
    grid_b = pl.cdiv(N, tn)
    beta_row = jnp.repeat(beta, D).reshape(1, M * D).astype(jnp.float32)

    def _wsum_kernel(z_ref, beta_ref, out_ref):
        zw = z_ref[...] * beta_ref[...]           # (tn, M*D) * (1, M*D) broadcast
        acc = zw[:, 0:D]
        for m in range(1, M):                     # M is small and static
            acc = acc + zw[:, m * D:(m + 1) * D]
        out_ref[...] = acc.astype(out_ref.dtype)

    out = pl.pallas_call(
        _wsum_kernel,
        out_shape=jax.ShapeDtypeStruct((N, D), z.dtype),
        grid=(grid_b,),
        in_specs=[
            pl.BlockSpec((tn, M * D), lambda i: (i, 0)),
            pl.BlockSpec((1, M * D), lambda i: (0, 0)),
        ],
        out_specs=pl.BlockSpec((tn, D), lambda i: (i, 0)),
        compiler_params=pltpu.CompilerParams(
            dimension_semantics=("parallel",)),
    )(z_r, beta_row)

    return out


def init_params(key, in_size, hidden_size):
    """PyTorch-Linear-style init (uniform +/- 1/sqrt(fan_in)); second Linear has no bias."""
    k1, k2, k3 = jax.random.split(key, 3)
    bound1 = 1.0 / math.sqrt(in_size)
    bound2 = 1.0 / math.sqrt(hidden_size)
    w1 = jax.random.uniform(k1, (in_size, hidden_size), jnp.float32, -bound1, bound1)
    b1 = jax.random.uniform(k2, (hidden_size,), jnp.float32, -bound1, bound1)
    w2 = jax.random.uniform(k3, (hidden_size, 1), jnp.float32, -bound2, bound2)
    return {"w1": w1, "b1": b1, "w2": w2}


def _reference(z, params):
    proj = jnp.tanh(z @ params["w1"] + params["b1"]) @ params["w2"]   # (N, M, 1)
    w = proj.mean(axis=0)                                             # (M, 1)
    beta = jax.nn.softmax(w, axis=0)                                  # (M, 1)
    return (beta[None, :, :] * z).sum(axis=1)                         # (N, D)


if __name__ == "__main__":
    key = jax.random.PRNGKey(0)
    k_z, k_p = jax.random.split(key)

    # Small shapes: N nodes, M metapaths, D=in_size, H=hidden_size (module default 128).
    N, M, D, H = 256, 4, 128, 128
    z = jax.random.normal(k_z, (N, M, D), jnp.float32)
    params = init_params(k_p, D, H)

    # Small tiles so the demo exercises multiple grid steps (4 per pass).
    out = semantic_attention_forward(z, params, tile_rows=256, tile_nodes=64)
    out = jax.block_until_ready(out)

    ref = _reference(z, params)
    assert out.shape == (N, D)
    # bf16 MXU inputs in pass 1 (f32 accumulation) -> compare vs f32 reference
    # at a loose-but-safe tolerance.
    max_err = float(jnp.max(jnp.abs(out - ref)))
    assert jnp.allclose(out, ref, atol=1e-2, rtol=1e-2), f"max abs err {max_err}"

    print("KERNEL_OK")
</pallas_src>

<mosaic_0001>
module attributes {stable_mosaic.version = 11 : i64} {
  func.func @_hsum_kernel(%arg0: i32, %arg1: memref<256x128xf32, #tpu.memory_space<vmem>>, %arg2: memref<128x128xbf16, #tpu.memory_space<vmem>>, %arg3: memref<1x128xf32, #tpu.memory_space<vmem>>, %arg4: memref<8x256xf32, #tpu.memory_space<vmem>>, %arg5: memref<1x8x128xf32, #tpu.memory_space<vmem>>) attributes {dimension_semantics = [#tpu.dimension_semantics<parallel>], iteration_bounds = array<i64: 4>, scalar_prefetch = 0 : i64, scratch_operands = 0 : i64, tpu.core_type = #tpu.core_type<tc>, window_params = [{transform_indices = @transform_0, window_bounds = array<i64: 256, 128>}, {pipeline_mode = #tpu.pipeline_mode<synchronous>, transform_indices = @transform_1, window_bounds = array<i64: 128, 128>}, {pipeline_mode = #tpu.pipeline_mode<synchronous>, transform_indices = @transform_2, window_bounds = array<i64: 1, 128>}, {pipeline_mode = #tpu.pipeline_mode<synchronous>, transform_indices = @transform_3, window_bounds = array<i64: 8, 256>}, {transform_indices = @transform_4, window_bounds = array<i64: 1, 8, 128>}]} {
    %c0 = arith.constant 0 : index
    %c0_0 = arith.constant 0 : index
    %0 = vector.load %arg1[%c0, %c0_0] : memref<256x128xf32, #tpu.memory_space<vmem>>, vector<256x128xf32>
    %1 = arith.truncf %0 : vector<256x128xf32> to vector<256x128xbf16>
    %c0_1 = arith.constant 0 : index
    %c0_2 = arith.constant 0 : index
    %2 = vector.load %arg2[%c0_1, %c0_2] : memref<128x128xbf16, #tpu.memory_space<vmem>>, vector<128x128xbf16>
    %cst = arith.constant dense<0.000000e+00> : vector<256x128xf32>
    %3 = tpu.matmul %1, %2, %cst {dimension_numbers = #tpu.dot_dimension_numbers<[1], [0], [0], [1], [0, 0, 1, 1], [], []>} : vector<256x128xbf16>, vector<128x128xbf16>, vector<256x128xf32> -> vector<256x128xf32>
    %c0_3 = arith.constant 0 : index
    %c0_4 = arith.constant 0 : index
    %4 = vector.load %arg3[%c0_3, %c0_4] : memref<1x128xf32, #tpu.memory_space<vmem>>, vector<1x128xf32>
    %5 = vector.broadcast %4 : vector<1x128xf32> to vector<256x128xf32>
    %6 = arith.addf %3, %5 : vector<256x128xf32>
    %7 = math.tanh %6 : vector<256x128xf32>
    %c0_5 = arith.constant 0 : index
    %c0_6 = arith.constant 0 : index
    %8 = vector.load %arg4[%c0_5, %c0_6] : memref<8x256xf32, #tpu.memory_space<vmem>>, vector<8x256xf32>
    %cst_7 = arith.constant dense<0.000000e+00> : vector<8x128xf32>
    %9 = tpu.matmul %8, %7, %cst_7 {dimension_numbers = #tpu.dot_dimension_numbers<[1], [0], [0], [1], [0, 0, 1, 1], [], []>} : vector<8x256xf32>, vector<256x128xf32>, vector<8x128xf32> -> vector<8x128xf32>
    %c0_8 = arith.constant 0 : index
    %c0_9 = arith.constant 0 : index
    %c0_10 = arith.constant 0 : index
    %10 = vector.load %arg5[%c0_8, %c0_9, %c0_10] : memref<1x8x128xf32, #tpu.memory_space<vmem>>, vector<1x8x128xf32>
    %11 = vector.shape_cast %10 : vector<1x8x128xf32> to vector<8x128xf32>
    %12 = vector.shape_cast %9 : vector<8x128xf32> to vector<1x8x128xf32>
    tpu.vector_store %arg5[%c0_8, %c0_9, %c0_10], %12 {strides = array<i32>} : memref<1x8x128xf32, #tpu.memory_space<vmem>>, vector<1x8x128xf32>,
    return
  }
  func.func @transform_0(%arg0: i32) -> (i32, i32) {
    %c0_i32 = arith.constant 0 : i32
    %c0_i32_0 = arith.constant 0 : i32
    return %arg0, %c0_i32 : i32, i32
  }
  func.func @transform_1(%arg0: i32) -> (i32, i32) {
    %c0_i32 = arith.constant 0 : i32
    %c0_i32_0 = arith.constant 0 : i32
    %c0_i32_1 = arith.constant 0 : i32
    return %c0_i32, %c0_i32_0 : i32, i32
  }
  func.func @transform_2(%arg0: i32) -> (i32, i32) {
    %c0_i32 = arith.constant 0 : i32
    %c0_i32_0 = arith.constant 0 : i32
    %c0_i32_1 = arith.constant 0 : i32
    return %c0_i32, %c0_i32_0 : i32, i32
  }
  func.func @transform_3(%arg0: i32) -> (i32, i32) {
    %c0_i32 = arith.constant 0 : i32
    %c0_i32_0 = arith.constant 0 : i32
    %c0_i32_1 = arith.constant 0 : i32
    return %c0_i32, %c0_i32_0 : i32, i32
  }
  func.func @transform_4(%arg0: i32) -> (i32, i32, i32) {
    %c0_i32 = arith.constant 0 : i32
    %c0_i32_0 = arith.constant 0 : i32
    %c0_i32_1 = arith.constant 0 : i32
    return %arg0, %c0_i32, %c0_i32_0 : i32, i32, i32
  }
}

</mosaic_0001>

<bundles_post_ra>
// kernel: tpu_custom_call.1
= control target key start
LH: loop header
LB: loop body
LE: loop exit
PB: predicated region body
PF: predicated region fallthrough
CT: control target
= control target key end

     0   :  { %9 = vsyncpa [#allocation3], 0  ;;  %s1489_s0 = inlined_call_operand.hbm [shape: f32[1024,128], index: 0, kind: input, shape index: {}]   ;;  %s1490_s1 = inlined_call_operand.hbm [shape: bf16[128,128], index: 1, kind: input, shape index: {}]   ;;  %s1491_s2 = inlined_call_operand.vmem [shape: f32[1,128], index: 2, kind: input, shape index: {}]   ;;  %s1492_s3 = inlined_call_operand.hbm [shape: f32[8,256], index: 3, kind: input, shape index: {}]   ;;  %s1493_s4 = inlined_call_operand.hbm [shape: f32[4,8,128], index: 4, kind: output, shape index: {}]  }
   0x1   :  { %11 = vsyncpa [#allocation3 + $0x1], 0 }
   0x2   :  { %12 = vsyncpa [#allocation6], 0 }
   0x3   :  { %13 = vsyncpa [#allocation4], 0 }
   0x4   :  { %15 = vsyncpa [#allocation4 + $0x1], 0  ;;  %s1209_s15 = smov 0   ;;  %s1211_s16 = smov 0  }
   0x5   :  { %s1213_s17 = smov 0   ;;  %s1215_s18 = smov 0  }
   0x6 LB: > { %s1230_s19 = sadd.s32 4294967295, %s1174_s18   ;;  %s733_s20 = sadd.s32 4294967294, %s1174_s18   ;;  %s1174_s18 = sphi %s1215_s18, %s1514_s18   ;;  %s1170_s17 = sphi %s1213_s17, %s1513_s17   ;;  %s1166_s16 = sphi %s1211_s16, %s1512_s16   ;;  %s1162_s15 = sphi %s1209_s15, %s1511_s15  }
   0x7   : > { %p41_p0 = scmp.ne.s32.totalorder %s1166_s16, %s1162_s15  ;;  %p1494_p1 = scmp.eq.s32.totalorder %s1230_s19, 0 }
   0x8   : > { %p134_p3 = scmp.eq.s32.totalorder %s733_s20, 3  ;;  %p734_p5 = scmp.ge.s32.totalorder %s1174_s18, 1 }
   0x9   : > { %p1239_p4 = por %p1494_p1, %p41_p0  ;;  %p141_p7 = scmp.lt.s32.totalorder %s1174_s18, 5 }
   0xa   : > { %p1244_p6 = por %p134_p3, %p41_p0  ;;  %s1176_s24 = smov [#allocation5]  }
   0xb   : > { %s1498_s21 = scalar_select %p1239_p4, 1, 0 }
   0xc   : > { %s1499_s22 = scalar_select %p1244_p6, 1, 0 }
   0xd   : > { %p1249_p8 = pnand %p734_p5, %p141_p7  ;;  %s153_s25 = sshll.u32 %s1176_s24, 4  ;;  %s154_s25 = int_to_ptr.vmem [resolvable:$true] %s153_s25 }
   0xe   : > { %s1177_s27 = smov [#allocation7]   ;;  %s1037_s29 = scalar_lea.vmem %s154_s25, 1024 }
   0xf   : > { %s1500_s23 = scalar_select %p1249_p8, 1, 0 }
  0x10   : > { %p895_p9 = pneg %p1249_p8  ;;  %s170_s28 = sshll.u32 %s1177_s27, 4  ;;  %s171_s28 = int_to_ptr.vmem [resolvable:$true] %s170_s28 }
  0x11   : > { %p1038_p12 = scmp.ne.s32.totalorder %s154_s25, %s1037_s29  ;;  %p1045_p3 = scmp.lt.s32.totalorder %s154_s25, %s154_s25 }
  0x12   : > { %p1257_p10 = pnand %p895_p9, %p1494_p1  ;;  %p1046_p5 = scmp.lt.s32.totalorder %s1037_s29, %s1037_s29 }
  0x14   : > { %p1028_p11 = pneg %p1257_p10  ;;  %p1047_p7 = por %p1046_p5, %p1045_p3 }
  0x16   : > { %p1040_p13 = pnand %p1038_p12, %p1028_p11 }
  0x18   : > { %p1041_p0 = pneg %p1040_p13 }
  0x1a   : > { %p1048_p9 = pnand %p1047_p7, %p1041_p0 }
  0x1c   : > { %1051 = shalt.err (!%p1048_p9)
}
  0x1d   : > { %s1178_s30 = smov 64   ;;  %s1179_s5 = smov 4  }
  0x1e   : > { %898 = dma.hbm_to_vmem [thread:$0]  (!%p1257_p10), %s1490_s1, 1024, %s154_s25, [#allocation6], %s1178_s30, %s1178_s30, %s1179_s5  }
  0x1f   : > { %s1063_s8 = scalar_lea.vmem %s171_s28, 256  ;;  %p1071_p2 = scmp.lt.s32.totalorder %s171_s28, %s171_s28 }
  0x20   : > { %p1064_p1 = scmp.ne.s32.totalorder %s171_s28, %s1063_s8  ;;  %p1072_p6 = scmp.lt.s32.totalorder %s1063_s8, %s1063_s8 }
  0x22   : > { %p1066_p12 = pnand %p1064_p1, %p1028_p11  ;;  %p1073_p3 = por %p1072_p6, %p1071_p2 }
  0x24   : > { %p1067_p13 = pneg %p1066_p12 }
  0x26   : > { %p1074_p0 = pnand %p1073_p3, %p1067_p13 }
  0x28   : > { %1077 = shalt.err (!%p1074_p0)
}
  0x29   : > { %901 = dma.hbm_to_vmem [thread:$0]  (!%p1257_p10), %s1492_s3, 256, %s171_s28, [#allocation6]  }
  0x2a   : > { %s1280_s11 = sadd.s32 1, %s1174_s18   ;;  %s28_s12 = sadd.s32 1, %s1170_s17 }
  0x2b   : > { %s25_s13 = ssub.s32 %s1174_s18, %s1280_s11  ;;  %p35_p1 = scmp.ne.s32.totalorder %s1170_s17, %s1166_s16 }
  0x2c   : > { %p26_p2 = scmp.eq.s32.totalorder %s25_s13, 0  ;;  %p36_p6 = scmp.eq.s32.totalorder %s1174_s18, 0 }
  0x2d   : > { %p1502_p11 = scmp.eq.s32.totalorder %s1230_s19, 3  ;;  %p912_p7 = scmp.lt.s32.totalorder %s1174_s18, 4 }
  0x2e   : > { %s1296_s20 = scalar_select %p26_p2, %s1170_s17, %s28_s12  }
  0x2f   : > { %p1290_p5 = por %p1502_p11, %p35_p1  ;;  %p37_p9 = por %p36_p6, %p35_p1 }
  0x30   : > { %s181_s24 = sand.u32 1, %s1170_s17   ;;  %s759_s26 = sshll.u32 %s1174_s18, 12 }
  0x31   : > { %s1503_s14 = scalar_select %p1290_p5, 1, 0 }
  0x32   : > { %s738_s25 = sshll.u32 %s181_s24, 8  ;;  %s1303_s29 = scalar_lea.hbm %s1489_s0, %s759_s26 }
  0x33   : > { %s185_s30 = scalar_lea.vmem [#allocation2], %s738_s25  ;;  %p1307_p10 = pnand %p912_p7, %p37_p9 }
  0x34   : > { %s192_s5 = sshll.u32 %s185_s30, 4  ;;  %s1311_s7 = scalar_lea.sflag [#allocation3], %s181_s24  ;;  %s1305_s5 = int_to_ptr.vmem [resolvable:$true] %s192_s5 }
  0x35   : > { %s1078_s8 = scalar_lea.hbm %s1303_s29, 4096  ;;  %p1080_p13 = pneg %p1307_p10 }
  0x36   : > { %p1079_p12 = scmp.ne.s32.totalorder %s1303_s29, %s1078_s8  ;;  %s1083_s12 = scalar_lea.hbm %s1489_s0, 16384 }
  0x37   : > { %p1084_p1 = scmp.lt.s32.totalorder %s1303_s29, %s1489_s0  ;;  %p1085_p2 = scmp.lt.s32.totalorder %s1083_s12, %s1078_s8 }
  0x38   : > { %p1081_p3 = pnand %p1080_p13, %p1079_p12 }
  0x39   : > { %p1086_p6 = por %p1085_p2, %p1084_p1 }
  0x3a   : > { %p1082_p0 = pneg %p1081_p3 }
  0x3c   : > { %p1087_p11 = pnand %p1086_p6, %p1082_p0 }
  0x3e   : > { %1090 = shalt.err (!%p1087_p11)
}
  0x3f   : > { %s1091_s24 = scalar_lea.vmem %s1305_s5, 4096  ;;  %s1180_s26 = smov [#allocation2]  }
  0x40   : > { %p1092_p7 = scmp.ne.s32.totalorder %s1305_s5, %s1091_s24  ;;  %s1096_s27 = sshll.u32 %s1180_s26, 4  ;;  %s1097_s27 = int_to_ptr.vmem [resolvable:$false] %s1096_s27 }
  0x41   : > { %s1098_s28 = scalar_lea.vmem %s1097_s27, 8192  ;;  %p1099_p3 = scmp.lt.s32.totalorder %s1305_s5, %s1097_s27 }
  0x42   : > { %p1094_p9 = pnand %p1092_p7, %p1080_p13  ;;  %p1100_p5 = scmp.lt.s32.totalorder %s1098_s28, %s1091_s24 }
  0x44   : > { %p1095_p12 = pneg %p1094_p9  ;;  %p1101_p4 = por %p1100_p5, %p1099_p3 }
  0x46   : > { %p1102_p8 = pnand %p1101_p4, %p1095_p12 }
  0x48   : > { %1105 = shalt.err (!%p1102_p8)
}
  0x49   : > { %s1181_s30 = smov 128   ;;  %s1182_s8 = smov 8  }
  0x4a   : > { %905 = dma.hbm_to_vmem [thread:$0]  (!%p1307_p10), %s1303_s29, 4096, %s1305_s5, %s1311_s7, %s1181_s30, %s1181_s30, %s1182_s8  }
  0x4b   : > { %p1505_p13 = scmp.ne.s32.totalorder %s1500_s23, 0 }
  0x4c   : > { %s1335_s9 = sand.u32 (!%p1505_p13), 1, %s1166_s16   ;;  %p1506_p4 = scmp.ne.s32.totalorder (!%p1505_p13), %s1498_s21, 0 }
  0x4d   : > { %204 = sbr.rel (%p1505_p13) target bundleno = 599 (0x257), region = 36  ;;  %s742_s10 = sshll.u32 (!%p1505_p13), %s1335_s9, 8 }
  0x4e   : > { %s207_s12 = scalar_lea.sflag (!%p1505_p13), [#allocation3], %s1335_s9  ;;  %s1339_s13 = scalar_lea.vmem (!%p1505_p13), [#allocation2], %s742_s10 }
  0x52   : > { %1149 = dma.done.wait (%p1506_p4), %s207_s12, 4096  }
  0x53   : > { %1151 = vsyncadd (%p1506_p4), %s207_s12, 4294963200  ;;  %p1507_p8 = scmp.eq.s32.totalorder %s1230_s19, 0 }
  0x55   : > { %1153 = dma.done.wait (%p1507_p8), [#allocation6], 1280   ;;  %p1508_p5 = pmov %p1507_p8 }
  0x56   : > { %v954_v0 = vld [vmem:[#allocation5 + $0x38] sm:$0xff]   ;;  %v955_v1 = vld [vmem:[#allocation5 + $0x30] sm:$0xff]   ;;  %v956_v2 = vld [vmem:[#allocation5 + $0x28] sm:$0xff]   ;;  %s745_s29 = sshll.u32 %s1335_s9, 3  ;;  %s756_s5 = sshll.u32 %s1230_s19, 7 }
  0x57   : > { %1155 = vsyncadd (%p1508_p5), [#allocation6], 4294966016  ;;  %819 = vmatprep.subr.bf16.mxu0 %v954_v0  ;;  %867 = vmatprep.subr.bf16.mxu1 %v954_v0  ;;  %v957_v3 = vld [vmem:[#allocation5 + $0x20] sm:$0xff]   ;;  %v246_v5 = vld [vmem:[%s1339_s13 + $0x8] sm:$0xff]  ;;  %s242_s6 = scalar_lea.vmem [#allocation8], %s745_s29  ;;  %s642_s26 = scalar_lea.hbm %s1493_s4, %s756_s5 }
  0x58   : > { %820 = vmatpush3.bf16.msra.mxu0 %v954_v0  ;;  %875 = vmatpush3.bf16.msra.mxu1 %v954_v0  ;;  %v245_v4 = vld [vmem:[%s1339_s13] sm:$0xff]  ;;  %v262_v8 = vld [vmem:[%s1339_s13 + $0x88] sm:$0xff]  ;;  %v958_v10 = vld [vmem:[#allocation5 + $0x18] sm:$0xff]   ;;  %s644_s7 = sshll.u32 %s242_s6, 4  ;;  %s631_s27 = scalar_lea.sflag [#allocation4], %s1335_s9  ;;  %s645_s7 = int_to_ptr.vmem [resolvable:$true] %s644_s7 }
  0x59   : > { %821 = vmatprep.subr.bf16.mxu0 %v955_v1  ;;  %868 = vmatprep.subr.bf16.mxu1 %v955_v1  ;;  %v261_v6 = vld [vmem:[%s1339_s13 + $0x80] sm:$0xff]  ;;  %v277_v7 = vpack.c.bf16 %v246_v5, %v245_v4  ;;  %v959_v11 = vld [vmem:[#allocation5 + $0x10] sm:$0xff]   ;;  %v960_v12 = vld [vmem:[#allocation5 + $0x8] sm:$0xff]   ;;  %s1106_s28 = scalar_lea.vmem %s645_s7, 128  ;;  %p1509_p0 = scmp.ne.s32.totalorder %s1503_s14, 0 }
  0x5a   : > { %v285_v9 = vpack.c.bf16 %v262_v8, %v261_v6  ;;  %v961_v13 = vld [vmem:[#allocation5] sm:$0xff]   ;;  %v247_v14 = vld [vmem:[%s1339_s13 + $0x10] sm:$0xff]  ;;  %v248_v15 = vld [vmem:[%s1339_s13 + $0x18] sm:$0xff]  ;;  %p1107_p10 = scmp.ne.s32.totalorder %s645_s7, %s1106_s28  ;;  %s1183_s30 = smov [#allocation8]  }
  0x5b   : > { %835 = vmatprep.mubr.bf16.mxu0 %v277_v7  ;;  %v263_v16 = vld [vmem:[%s1339_s13 + $0x90] sm:$0xff]  ;;  %v264_v17 = vld [vmem:[%s1339_s13 + $0x98] sm:$0xff]  ;;  %v249_v18 = vld [vmem:[%s1339_s13 + $0x20] sm:$0xff]  ;;  %v278_v22 = vpack.c.bf16 %v248_v15, %v247_v14  ;;  %s1110_s8 = sshll.u32 %s1183_s30, 4  ;;  %s1111_s8 = int_to_ptr.vmem [resolvable:$false] %s1110_s8 }
  0x5c   : > { %822 = vmatpush3.bf16.msra.mxu0 %v955_v1  ;;  %876 = vmatpush3.bf16.msra.mxu1 %v955_v1  ;;  %v250_v19 = vld [vmem:[%s1339_s13 + $0x28] sm:$0xff]  ;;  %v265_v20 = vld [vmem:[%s1339_s13 + $0xa0] sm:$0xff]  ;;  %v286_v23 = vpack.c.bf16 %v264_v17, %v263_v16  ;;  %v251_v26 = vld [vmem:[%s1339_s13 + $0x30] sm:$0xff]  ;;  %p1108_p1 = pnand %p1107_p10, %p1509_p0  ;;  %s1112_s19 = scalar_lea.vmem %s1111_s8, 256 }
  0x5d   : > { %823 = vmatprep.subr.bf16.mxu0 %v956_v2  ;;  %869 = vmatprep.subr.bf16.mxu1 %v956_v2  ;;  %v266_v21 = vld [vmem:[%s1339_s13 + $0xa8] sm:$0xff]  ;;  %v279_v24 = vpack.c.bf16 %v250_v19, %v249_v18  ;;  %v252_v27 = vld [vmem:[%s1339_s13 + $0x38] sm:$0xff]  ;;  %v267_v28 = vld [vmem:[%s1339_s13 + $0xb0] sm:$0xff]  ;;  %p1113_p6 = scmp.lt.s32.totalorder %s645_s7, %s1111_s8  ;;  %p1114_p11 = scmp.lt.s32.totalorder %s1112_s19, %s1106_s28 }
  0x5e   : > { %851 = vmatprep.mubr.bf16.mxu1 %v285_v9  ;;  %v287_v25 = vpack.c.bf16 %v266_v21, %v265_v20  ;;  %v268_v29 = vld [vmem:[%s1339_s13 + $0xb8] sm:$0xff]  ;;  %v253_v30 = vld [vmem:[%s1339_s13 + $0x40] sm:$0xff]  ;;  %v254_v31 = vld [vmem:[%s1339_s13 + $0x48] sm:$0xff]  ;;  %v280_v34 = vpack.c.bf16 %v252_v27, %v251_v26  ;;  %p1109_p2 = pneg %p1108_p1 }
  0x5f   : > { %v269_v32 = vld [vmem:[%s1339_s13 + $0xc0] sm:$0xff]  ;;  %v270_v33 = vld [vmem:[%s1339_s13 + $0xc8] sm:$0xff]  ;;  %v288_v35 = vpack.c.bf16 %v268_v29, %v267_v28  ;;  %v281_v36 = vpack.c.bf16 %v254_v31, %v253_v30  ;;  %v255_v38 = vld [vmem:[%s1339_s13 + $0x50] sm:$0xff]  ;;  %p1115_p7 = por %p1114_p11, %p1113_p6 }
  0x60   : > { %824 = vmatpush3.bf16.msra.mxu0 %v956_v2  ;;  %877 = vmatpush3.bf16.msra.mxu1 %v956_v2  ;;  %v289_v37 = vpack.c.bf16 %v270_v33, %v269_v32  ;;  %v256_v39 = vld [vmem:[%s1339_s13 + $0x58] sm:$0xff]  ;;  %v271_v40 = vld [vmem:[%s1339_s13 + $0xd0] sm:$0xff]  ;;  %v257_v42 = vld [vmem:[%s1339_s13 + $0x60] sm:$0xff] }
  0x61   : > { %825 = vmatprep.subr.bf16.mxu0 %v957_v3  ;;  %870 = vmatprep.subr.bf16.mxu1 %v957_v3  ;;  %v272_v41 = vld [vmem:[%s1339_s13 + $0xd8] sm:$0xff]  ;;  %v258_v43 = vld [vmem:[%s1339_s13 + $0x68] sm:$0xff]  ;;  %v273_v44 = vld [vmem:[%s1339_s13 + $0xe0] sm:$0xff]  ;;  %v282_v46 = vpack.c.bf16 %v256_v39, %v255_v38  ;;  %p1116_p9 = pnand %p1115_p7, %p1109_p2 }
  0x62   : > { %v274_v45 = vld [vmem:[%s1339_s13 + $0xe8] sm:$0xff]  ;;  %v290_v47 = vpack.c.bf16 %v272_v41, %v271_v40  ;;  %v283_v48 = vpack.c.bf16 %v258_v43, %v257_v42  ;;  %v259_v50 = vld [vmem:[%s1339_s13 + $0x70] sm:$0xff]  ;;  %v260_v51 = vld [vmem:[%s1339_s13 + $0x78] sm:$0xff] }
  0x63   : > { %v291_v49 = vpack.c.bf16 %v274_v45, %v273_v44  ;;  %v275_v52 = vld [vmem:[%s1339_s13 + $0xf0] sm:$0xff]  ;;  %v276_v53 = vld [vmem:[%s1339_s13 + $0xf8] sm:$0xff]  ;;  %v284_v54 = vpack.c.bf16 %v260_v51, %v259_v50  ;;  %v558_v56 = vld [vmem:[#allocation7 + $0x8] sm:$0xff] }
  0x64   : > { %826 = vmatpush3.bf16.msra.mxu0 %v957_v3  ;;  %878 = vmatpush3.bf16.msra.mxu1 %v957_v3  ;;  %v292_v55 = vpack.c.bf16 %v276_v53, %v275_v52  ;;  %v1408_v21 = vld [vmem:[%s1491_s2] ss:$0 sm:$0xff] }
  0x65   : > { %827 = vmatprep.subr.bf16.mxu0 %v958_v10  ;;  %871 = vmatprep.subr.bf16.mxu1 %v958_v10 }
  0x68   : > { %828 = vmatpush3.bf16.msra.mxu0 %v958_v10  ;;  %879 = vmatpush3.bf16.msra.mxu1 %v958_v10 }
  0x69   : > { %829 = vmatprep.subr.bf16.mxu0 %v959_v11  ;;  %872 = vmatprep.subr.bf16.mxu1 %v959_v11 }
  0x6c   : > { %830 = vmatpush3.bf16.msra.mxu0 %v959_v11  ;;  %880 = vmatpush3.bf16.msra.mxu1 %v959_v11 }
  0x6d   : > { %831 = vmatprep.subr.bf16.mxu0 %v960_v12  ;;  %873 = vmatprep.subr.bf16.mxu1 %v960_v12 }
  0x70   : > { %832 = vmatpush3.bf16.msra.mxu0 %v960_v12  ;;  %881 = vmatpush3.bf16.msra.mxu1 %v960_v12 }
  0x71   : > { %833 = vmatprep.subr.bf16.mxu0 %v961_v13  ;;  %874 = vmatprep.subr.bf16.mxu1 %v961_v13 }
  0x74   : > { %834 = vmatpush3.bf16.msra.mxu0 %v961_v13  ;;  %882 = vmatpush3.bf16.msra.mxu1 %v961_v13 }
  0x77   : > { %836 = vmatmul.mubr.bf16.vlgmr.msra.gmra.mxu0 %v278_v22  ;;  %852 = vmatmul.mubr.bf16.vlgmr.msra.gmra.mxu1 %v286_v23 }
  0x78   : > { %839 = vmatprep.mubr.bf16.mxu0 %v279_v24  ;;  %855 = vmatprep.mubr.bf16.mxu1 %v287_v25 }
  0x7f   : > { %840 = vmatmul.mubr.bf16.gmra.mxu0 %v280_v34  ;;  %856 = vmatmul.mubr.bf16.gmra.mxu1 %v288_v35 }
  0x80   : > { %843 = vmatprep.mubr.bf16.mxu0 %v281_v36  ;;  %859 = vmatprep.mubr.bf16.mxu1 %v289_v37 }
  0x87   : > { %844 = vmatmul.mubr.bf16.gmra.mxu0 %v282_v46  ;;  %860 = vmatmul.mubr.bf16.gmra.mxu1 %v290_v47 }
  0x88   : > { %847 = vmatprep.mubr.bf16.mxu0 %v283_v48  ;;  %863 = vmatprep.mubr.bf16.mxu1 %v291_v49 }
  0x8f   : > { %848 = vmatmul.mubr.bf16.gmra.mxu0 %v284_v54  ;;  %864 = vmatmul.mubr.bf16.gmra.mxu1 %v292_v55 }
  0x90   : > { %623 = vmatprep.mubr.f32.mxu1 %v558_v56 }
 0x137   : > { %v1381_v57 = vpop.f32.mrf.mxu0  ;;  %v1383_v58 = vpop.f32.mrf.mxu1 }
 0x139   : > { %v1385_v59 = vpop.f32.mrf.mxu0  ;;  %v1387_v60 = vpop.f32.mrf.mxu1 }
 0x13b   : > { %v1389_v61 = vpop.f32.mrf.mxu0  ;;  %v1391_v62 = vpop.f32.mrf.mxu1 }
 0x13d   : > { %v1393_v63 = vpop.f32.mrf.mxu0  ;;  %v1395_v0 = vpop.f32.mrf.mxu1 }
 0x13f   : > { %v1397_v1 = vpop.f32.mrf.mxu0  ;;  %v857_v2 = vpop.f32.mrf.mxu1 }
 0x140   : > { %v487_v46 = vadd.f32 %v857_v2, %v1408_v21  ;;  %v423_v48 = vadd.f32 %v1397_v1, %v1408_v21  ;;  %v474_v2 = vadd.f32 %v1391_v62, %v1408_v21 }
 0x141   : > { %v1399_v3 = vpop.f32.mrf.mxu0  ;;  %v1401_v4 = vpop.f32.mrf.mxu1 }
 0x142   : > { %v479_v54 = vadd.f32 %v1408_v21, %v1401_v4  ;;  %v415_v56 = vadd.f32 %v1408_v21, %v1399_v3 }
 0x143   : > { %v842_v5 = vpop.f32.mrf.mxu0  ;;  %v858_v6 = vpop.f32.mrf.mxu1 }
 0x144   : > { %v490_v43 = vadd.f32 %v858_v6, %v1408_v21  ;;  %v426_v45 = vadd.f32 %v842_v5, %v1408_v21  ;;  %v410_v6 = vadd.f32 %v1389_v61, %v1408_v21 }
 0x145   : > { %v1403_v7 = vpop.f32.mrf.mxu0  ;;  %v481_v8 = vpop.f32.mrf.mxu1 }
 0x146   : > { %v482_v50 = vadd.f32 %v1408_v21, %v481_v8  ;;  %v418_v52 = vadd.f32 %v1408_v21, %v1403_v7  ;;  %v471_v7 = vadd.f32 %v1383_v58, %v1408_v21  ;;  %v407_v8 = vadd.f32 %v1381_v57, %v1408_v21 }
 0x147   : > { %v845_v9 = vpop.f32.mrf.mxu0  ;;  %v861_v10 = vpop.f32.mrf.mxu1 }
 0x148   : > { %v503_v36 = vadd.f32 %v861_v10, %v1408_v21  ;;  %v439_v37 = vadd.f32 %v845_v9, %v1408_v21  ;;  %v466_v9 = vadd.f32 %v1408_v21, %v1395_v0  ;;  %v402_v10 = vadd.f32 %v1408_v21, %v1393_v63 }
 0x149   : > { %v430_v11 = vpop.f32.mrf.mxu0  ;;  %v494_v12 = vpop.f32.mrf.mxu1 }
 0x14a   : > { %v495_v40 = vadd.f32 %v1408_v21, %v494_v12  ;;  %v431_v41 = vadd.f32 %v1408_v21, %v430_v11  ;;  %v463_v11 = vadd.f32 %v1408_v21, %v1387_v60  ;;  %v399_v12 = vadd.f32 %v1408_v21, %v1385_v59 }
 0x14b   : > { %v846_v13 = vpop.f32.mrf.mxu0  ;;  %v862_v14 = vpop.f32.mrf.mxu1 }
 0x14c   : > { %v506_v34 = vadd.f32 %v862_v14, %v1408_v21  ;;  %v442_v35 = vadd.f32 %v846_v13, %v1408_v21 }
 0x14d   : > { %v433_v15 = vpop.f32.mrf.mxu0  ;;  %v497_v16 = vpop.f32.mrf.mxu1 }
 0x14e   : > { %v498_v38 = vadd.f32 %v1408_v21, %v497_v16  ;;  %v434_v39 = vadd.f32 %v1408_v21, %v433_v15 }
 0x14f   : > { %v849_v17 = vpop.f32.mrf.mxu0  ;;  %v865_v18 = vpop.f32.mrf.mxu1 }
 0x150   : > { %v519_v26 = vadd.f32 %v865_v18, %v1408_v21  ;;  %v455_v29 = vadd.f32 %v849_v17, %v1408_v21 }
 0x151   : > { %v446_v19 = vpop.f32.mrf.mxu0  ;;  %v510_v20 = vpop.f32.mrf.mxu1 }
 0x152   : > { %v511_v32 = vadd.f32 %v1408_v21, %v510_v20  ;;  %v447_v33 = vadd.f32 %v1408_v21, %v446_v19 }
 0x153   : > { %v850_v22 = vpop.f32.mrf.mxu0  ;;  %v866_v23 = vpop.f32.mrf.mxu1 }
 0x154   : > { %v458_v24 = vadd.f32 %v850_v22, %v1408_v21  ;;  %v522_v25 = vadd.f32 %v866_v23, %v1408_v21 }
 0x155   : > { %v449_v27 = vpop.f32.mrf.mxu0  ;;  %v513_v28 = vpop.f32.mrf.mxu1 }
 0x156   : > { %962 = vtanh.f32 %v458_v24  ;;  %v514_v30 = vadd.f32 %v1408_v21, %v513_v28  ;;  %v450_v31 = vadd.f32 %v1408_v21, %v449_v27 }
 0x157   : > { %964 = vtanh.f32 %v522_v25  ;;  %v557_v25 = vld [vmem:[#allocation7] sm:$0xff] }
 0x158   : > { %966 = vtanh.f32 %v519_v26 }
 0x159   : > { %968 = vtanh.f32 %v455_v29 }
 0x15a   : > { %970 = vtanh.f32 %v514_v30 }
 0x15b   : > { %972 = vtanh.f32 %v450_v31 }
 0x15c   : > { %974 = vtanh.f32 %v511_v32 }
 0x15d   : > { %976 = vtanh.f32 %v447_v33 }
 0x15e   : > { %978 = vtanh.f32 %v506_v34 }
 0x15f   : > { %980 = vtanh.f32 %v442_v35 }
 0x160   : > { %982 = vtanh.f32 %v503_v36 }
 0x161   : > { %984 = vtanh.f32 %v439_v37 }
 0x162   : > { %986 = vtanh.f32 %v498_v38 }
 0x163   : > { %v963_v42 = vpop.eup %962  ;;  %988 = vtanh.f32 %v434_v39 }
 0x164   : > { %v965_v44 = vpop.eup %964  ;;  %990 = vtanh.f32 %v495_v40 }
 0x165   : > { %784 = vmatprep.subr.mxu1 %v965_v44  ;;  %v967_v47 = vpop.eup %966  ;;  %992 = vtanh.f32 %v431_v41 }
 0x166   : > { %785 = vmatpush3.msra.mxu1 %v963_v42  ;;  %v969_v49 = vpop.eup %968  ;;  %994 = vtanh.f32 %v490_v43 }
 0x167   : > { %786 = vmatprep.subr.mxu1 %v967_v47  ;;  %v971_v51 = vpop.eup %970  ;;  %996 = vtanh.f32 %v426_v45 }
 0x168   : > { %787 = vmatpush3.msra.mxu1 %v969_v49  ;;  %v973_v53 = vpop.eup %972  ;;  %998 = vtanh.f32 %v487_v46 }
 0x169   : > { %788 = vmatprep.subr.mxu1 %v971_v51  ;;  %v975_v55 = vpop.eup %974  ;;  %1000 = vtanh.f32 %v423_v48 }
 0x16a   : > { %789 = vmatpush3.msra.mxu1 %v973_v53  ;;  %v977_v1 = vpop.eup %976  ;;  %1002 = vtanh.f32 %v482_v50 }
 0x16b   : > { %790 = vmatprep.subr.mxu1 %v975_v55  ;;  %v979_v5 = vpop.eup %978  ;;  %1004 = vtanh.f32 %v418_v52 }
 0x16c   : > { %791 = vmatpush3.msra.mxu1 %v977_v1  ;;  %v981_v4 = vpop.eup %980  ;;  %1006 = vtanh.f32 %v479_v54 }
 0x16d   : > { %792 = vmatprep.subr.mxu1 %v979_v5  ;;  %v983_v3 = vpop.eup %982  ;;  %1008 = vtanh.f32 %v415_v56 }
 0x16e   : > { %793 = vmatpush3.msra.mxu1 %v981_v4  ;;  %v985_v62 = vpop.eup %984  ;;  %1010 = vtanh.f32 %v474_v2 }
 0x16f   : > { %794 = vmatprep.subr.mxu1 %v983_v3  ;;  %v987_v61 = vpop.eup %986  ;;  %1012 = vtanh.f32 %v410_v6 }
 0x170   : > { %795 = vmatpush3.msra.mxu1 %v985_v62  ;;  %v989_v58 = vpop.eup %988  ;;  %1014 = vtanh.f32 %v471_v7 }
 0x171   : > { %796 = vmatprep.subr.mxu1 %v987_v61  ;;  %v991_v57 = vpop.eup %990  ;;  %1016 = vtanh.f32 %v407_v8 }
 0x172   : > { %797 = vmatpush3.msra.mxu1 %v989_v58  ;;  %v993_v0 = vpop.eup %992  ;;  %1018 = vtanh.f32 %v466_v9 }
 0x173   : > { %798 = vmatprep.subr.mxu1 %v991_v57  ;;  %v995_v13 = vpop.eup %994  ;;  %1020 = vtanh.f32 %v402_v10 }
 0x174   : > { %799 = vmatpush3.msra.mxu1 %v993_v0  ;;  %v997_v63 = vpop.eup %996  ;;  %1022 = vtanh.f32 %v463_v11 }
 0x175   : > { %800 = vmatprep.subr.mxu1 %v995_v13  ;;  %v999_v14 = vpop.eup %998  ;;  %1024 = vtanh.f32 %v399_v12 }
 0x176   : > { %801 = vmatpush3.msra.mxu1 %v997_v63  ;;  %v1001_v60 = vpop.eup %1000 }
 0x177   : > { %802 = vmatprep.subr.mxu1 %v999_v14  ;;  %v1003_v15 = vpop.eup %1002 }
 0x178   : > { %803 = vmatpush3.msra.mxu1 %v1001_v60  ;;  %v1005_v16 = vpop.eup %1004 }
 0x179   : > { %804 = vmatprep.subr.mxu1 %v1003_v15  ;;  %v1007_v59 = vpop.eup %1006 }
 0x17a   : > { %805 = vmatpush3.msra.mxu1 %v1005_v16  ;;  %v1009_v17 = vpop.eup %1008 }
 0x17b   : > { %806 = vmatprep.subr.mxu1 %v1007_v59  ;;  %v1011_v18 = vpop.eup %1010 }
 0x17c   : > { %807 = vmatpush3.msra.mxu1 %v1009_v17  ;;  %v1013_v19 = vpop.eup %1012 }
 0x17d   : > { %808 = vmatprep.subr.mxu1 %v1011_v18  ;;  %v1015_v20 = vpop.eup %1014 }
 0x17e   : > { %809 = vmatpush3.msra.mxu1 %v1013_v19  ;;  %v1017_v21 = vpop.eup %1016 }
 0x17f   : > { %810 = vmatprep.subr.mxu1 %v1015_v20  ;;  %v1019_v22 = vpop.eup %1018 }
 0x180   : > { %811 = vmatpush3.msra.mxu1 %v1017_v21  ;;  %v1021_v23 = vpop.eup %1020 }
 0x181   : > { %812 = vmatprep.subr.mxu1 %v1019_v22  ;;  %v1023_v24 = vpop.eup %1022 }
 0x182   : > { %813 = vmatpush3.msra.mxu1 %v1021_v23  ;;  %v1025_v26 = vpop.eup %1024 }
 0x183   : > { %814 = vmatprep.subr.mxu1 %v1023_v24 }
 0x184   : > { %815 = vmatpush3.msra.mxu1 %v1025_v26 }
 0x185   : > { %624 = vmatmul.mubr.f32.vlgmr.msra.gmra.mxu1 %v557_v25 }
 0x245   : > { %v816_v27 = vpop.f32.mrf.mxu1 }
 0x247   : > { %v817_v28 = vpop.f32.mrf.mxu1 }
 0x248   : > { %v818_v29 = vadd.f32 %v817_v28, %v816_v27 }
 0x24a   : > { %629 = vst [vmem:[%s242_s6] sm:$0xff] %v818_v29 }
 0x24b   : > { %1119 = shalt.err (!%p1116_p9)
}
 0x24c   : > { %s1120_s10 = scalar_lea.hbm %s642_s26, 128  ;;  %s1124_s13 = scalar_lea.hbm %s1493_s4, 512 }
 0x24d   : > { %p1121_p12 = scmp.ne.s32.totalorder %s642_s26, %s1120_s10  ;;  %p1125_p4 = scmp.lt.s32.totalorder %s642_s26, %s1493_s4 }
 0x24e   : > { %p1126_p8 = scmp.lt.s32.totalorder %s1124_s13, %s1120_s10 }
 0x24f   : > { %p1122_p3 = pnand %p1121_p12, %p1509_p0 }
 0x250   : > { %p1127_p5 = por %p1126_p8, %p1125_p4 }
 0x251   : > { %p1123_p13 = pneg %p1122_p3 }
 0x253   : > { %p1128_p10 = pnand %p1127_p5, %p1123_p13 }
 0x255   : > { %1131 = shalt.err (!%p1128_p10)
}
 0x256   : > { %893 = dma.vmem_to_hbm [thread:$0]  (%p1509_p0), %s645_s7, 128, %s642_s26, %s631_s27  }
 0x257 PF: > { %p915_p1 = scmp.ge.s32.totalorder %s1174_s18, 2  ;;  %s656_s29 = sand.u32 1, %s1162_s15  }
 0x258   : > { %p1510_p2 = scmp.ne.s32.totalorder %s1499_s22, 0  ;;  %s657_s5 = scalar_lea.sflag [#allocation4], %s656_s29 }
 0x25a   : > { %p907_p6 = pnand %p915_p1, %p1510_p2 }
 0x25c   : > { %p908_p11 = pneg %p907_p6 }
 0x25e   : > { %1157 = dma.done.wait (%p908_p11), %s657_s5, 128  }
 0x25f   : > { %1159 = vsyncadd (%p908_p11), %s657_s5, 4294967168  ;;  %p18_p7 = scmp.ge.s32.totalorder %s1280_s11, 6   ;;  %s1511_s15 = smov %s1166_s16 }
 0x260   : > { %s1512_s16 = smov %s1170_s17  ;;  %s1513_s17 = smov %s1296_s20 }
 0x261   : > { %s1514_s18 = smov %s1280_s11  ;;  %20 = sbr.rel (!%p18_p7) target bundleno = 6 (0x6), region = 89 }
 0x266   :  { %662 = vsyncpa [#allocation3], 1 }
 0x267   :  { %664 = vsyncpa [#allocation3 + $0x1], 1 }
 0x268   :  { %665 = vsyncpa [#allocation6], 1 }
 0x269   :  { %666 = vsyncpa [#allocation4], 1 }
 0x26a   :  { %668 = vsyncpa [#allocation4 + $0x1], 1 }

</bundles_post_ra>
